<compile_context>
chip_gen: v5e
topology: v5e:2x2
jax: 0.10.0
libtpu: 0.0.40
codegen_flags: <defaults>
</compile_context>

<pallas_src>
import functools

import jax
import jax.numpy as jnp
from jax import lax
from jax.experimental import pallas as pl
from jax.experimental.pallas import tpu as pltpu


# ----------------------------- Pallas kernels ------------------------------

def _gemm_bias_relu_kernel(x_ref, w_ref, b_ref, o_ref):
    # out = relu(x @ w + bias)   (normalization / FrozenBN pre-folded into w,b)
    acc = jnp.dot(x_ref[...], w_ref[...], preferred_element_type=jnp.float32)
    acc = acc + b_ref[...]                               # f32 epilogue
    o_ref[...] = jnp.maximum(acc, 0.0).astype(o_ref.dtype)


def _stem2_bk1_kernel(p_ref, w2_ref, b2_ref, w1_ref, b1_ref, x_ref, o_ref):
    # x = relu(patches @ w2 + b2)     (stem conv2, 3x3 stride 2)  -> shortcut
    # o = relu(x       @ w1 + b1)     (bottleneck conv1, 1x1)
    x = jnp.dot(p_ref[...], w2_ref[...], preferred_element_type=jnp.float32)
    x = jnp.maximum(x + b2_ref[...], 0.0)
    x_ref[...] = x.astype(x_ref.dtype)
    o = jnp.dot(x.astype(w1_ref.dtype), w1_ref[...],
                preferred_element_type=jnp.float32)
    o_ref[...] = jnp.maximum(o + b1_ref[...], 0.0).astype(o_ref.dtype)


def _bk2_bk3_kernel(p_ref, w2_ref, b2_ref, w3_ref, b3_ref, r_ref, o_ref):
    # t = relu(patches @ w2 + b2)                 (bottleneck conv2, 3x3)
    # o = relu(t @ w3 + b3 + residual)            (bottleneck conv3, 1x1 + add)
    t = jnp.dot(p_ref[...], w2_ref[...], preferred_element_type=jnp.float32)
    t = jnp.maximum(t + b2_ref[...], 0.0)
    o = jnp.dot(t.astype(w3_ref.dtype), w3_ref[...],
                preferred_element_type=jnp.float32)
    o = o + b3_ref[...] + r_ref[...].astype(jnp.float32)
    o_ref[...] = jnp.maximum(o, 0.0).astype(o_ref.dtype)


def _roi_pool_kernel(boxes_ref, feat_ref, o_ref, *, hf, wf, spatial_scale):
    # boxes_ref: (R_pad, 5) f32 [batch_idx, x1, y1, x2, y2]   (VMEM)
    # feat_ref : (B*hf*wf, C)  bf16                           (VMEM)
    # One invocation handles ALL ROIs of ALL images:
    #   pooled = (mask @ feat) * 1/count     (mask reduction on the MXU).
    n_rows = feat_ref.shape[0]
    idx = lax.broadcasted_iota(jnp.int32, (1, n_rows), 1)
    b_of = (idx // (hf * wf)).astype(jnp.float32)
    rem = idx % (hf * wf)
    hh = (rem // wf).astype(jnp.float32) + 0.5
    ww = (rem % wf).astype(jnp.float32) + 0.5

    boxes = boxes_ref[...]
    rb = boxes[:, 0:1]
    x1 = boxes[:, 1:2] * spatial_scale
    y1 = boxes[:, 2:3] * spatial_scale
    x2 = boxes[:, 3:4] * spatial_scale
    y2 = boxes[:, 4:5] * spatial_scale

    mask = ((b_of == rb) & (ww >= x1) & (ww <= x2) &
            (hh >= y1) & (hh <= y2))                       # (R_pad, B*hf*wf)
    cnt = jnp.maximum(jnp.sum(mask.astype(jnp.float32), axis=-1,
                              keepdims=True), 1.0)         # (R_pad, 1)
    pooled = jnp.dot(mask.astype(feat_ref.dtype), feat_ref[...],
                     preferred_element_type=jnp.float32)   # (R_pad, C)
    o_ref[...] = (pooled * pl.reciprocal(cnt, approx=True)).astype(o_ref.dtype)


# ------------------------------- wrappers -----------------------------------

def _pick_tm(m):
    for cand in (256, 128, 64, 32, 16, 8):
        if m % cand == 0:
            return cand
    return m


_PARALLEL1 = pltpu.CompilerParams(dimension_semantics=("parallel",))


def conv_gemm(patches, w, bias, out_dtype=jnp.bfloat16):
    m, k = patches.shape
    n = w.shape[1]
    tm = _pick_tm(m)
    return pl.pallas_call(
        _gemm_bias_relu_kernel,
        grid=(m // tm,),
        in_specs=[pl.BlockSpec((tm, k), lambda i: (i, 0)),
                  pl.BlockSpec((k, n), lambda i: (0, 0)),
                  pl.BlockSpec((1, n), lambda i: (0, 0))],
        out_specs=pl.BlockSpec((tm, n), lambda i: (i, 0)),
        out_shape=jax.ShapeDtypeStruct((m, n), out_dtype),
        compiler_params=_PARALLEL1,
    )(patches, w, bias.reshape(1, n).astype(jnp.float32))


def stem2_bk1(patches, w2, b2, w1, b1):
    m, k = patches.shape
    n2 = w2.shape[1]
    n1 = w1.shape[1]
    tm = _pick_tm(m)
    return pl.pallas_call(
        _stem2_bk1_kernel,
        grid=(m // tm,),
        in_specs=[pl.BlockSpec((tm, k), lambda i: (i, 0)),
                  pl.BlockSpec((k, n2), lambda i: (0, 0)),
                  pl.BlockSpec((1, n2), lambda i: (0, 0)),
                  pl.BlockSpec((n2, n1), lambda i: (0, 0)),
                  pl.BlockSpec((1, n1), lambda i: (0, 0))],
        out_specs=[pl.BlockSpec((tm, n2), lambda i: (i, 0)),
                   pl.BlockSpec((tm, n1), lambda i: (i, 0))],
        out_shape=[jax.ShapeDtypeStruct((m, n2), jnp.bfloat16),
                   jax.ShapeDtypeStruct((m, n1), jnp.bfloat16)],
        compiler_params=_PARALLEL1,
    )(patches, w2, b2.reshape(1, n2).astype(jnp.float32),
      w1, b1.reshape(1, n1).astype(jnp.float32))


def bk2_bk3(patches, w2, b2, w3, b3, residual):
    m, k = patches.shape
    n2 = w2.shape[1]
    n3 = w3.shape[1]
    tm = _pick_tm(m)
    return pl.pallas_call(
        _bk2_bk3_kernel,
        grid=(m // tm,),
        in_specs=[pl.BlockSpec((tm, k), lambda i: (i, 0)),
                  pl.BlockSpec((k, n2), lambda i: (0, 0)),
                  pl.BlockSpec((1, n2), lambda i: (0, 0)),
                  pl.BlockSpec((n2, n3), lambda i: (0, 0)),
                  pl.BlockSpec((1, n3), lambda i: (0, 0)),
                  pl.BlockSpec((tm, n3), lambda i: (i, 0))],
        out_specs=pl.BlockSpec((tm, n3), lambda i: (i, 0)),
        out_shape=jax.ShapeDtypeStruct((m, n3), jnp.bfloat16),
        compiler_params=_PARALLEL1,
    )(patches, w2, b2.reshape(1, n2).astype(jnp.float32),
      w3, b3.reshape(1, n3).astype(jnp.float32), residual)


def roi_avg_pool(feat_bhwc, boxes5, spatial_scale):
    b, hf, wf, c = feat_bhwc.shape
    r_pad = boxes5.shape[0]
    feat2d = feat_bhwc.reshape(b * hf * wf, c)
    kernel = functools.partial(_roi_pool_kernel, hf=hf, wf=wf,
                               spatial_scale=float(spatial_scale))
    return pl.pallas_call(
        kernel,
        out_shape=jax.ShapeDtypeStruct((r_pad, c), jnp.float32),
        in_specs=[pl.BlockSpec((r_pad, 5), lambda: (0, 0)),
                  pl.BlockSpec((b * hf * wf, c), lambda: (0, 0))],
        out_specs=pl.BlockSpec((r_pad, c), lambda: (0, 0)),
    )(boxes5, feat2d)


def _im2col(x_bhwc, ksize, stride, pad, pad_value=None):
    """Batched im2col (JAX glue). Returns (B*ho*wo, k*k*C), ho, wo."""
    b, h, w, c = x_bhwc.shape
    ho = (h + 2 * pad - ksize) // stride + 1
    wo = (w + 2 * pad - ksize) // stride + 1
    if pad_value is None:
        xp = jnp.pad(x_bhwc, ((0, 0), (pad, pad), (pad, pad), (0, 0)))
    else:
        xp = jnp.broadcast_to(pad_value.reshape(1, 1, 1, c),
                              (b, h + 2 * pad, w + 2 * pad, c)).astype(x_bhwc.dtype)
        xp = xp.at[:, pad:pad + h, pad:pad + w, :].set(x_bhwc)
    cols = []
    for di in range(ksize):
        for dj in range(ksize):
            cols.append(xp[:, di:di + stride * ho:stride,
                           dj:dj + stride * wo:stride, :])
    patches = jnp.stack(cols, axis=3)                 # (b, ho, wo, k*k, c)
    return patches.reshape(b * ho * wo, ksize * ksize * c), ho, wo


# ------------------------------- the module ---------------------------------

class ResNetROIPoolPallas:
    # channel widths are multiples of 128 so every GEMM output is lane-dense
    C_STEM = 128
    C_RES = 128          # channel width of the res4-like output feature
    C_BOTTLENECK = 128   # bottleneck_channels (scaled-down 256)
    STRIDE = 4           # backbone output stride -> pooler_scales = (1/4,)

    def __init__(self, key):
        ks = jax.random.split(key, 10)

        def w_init(k, shape):
            fan_in = shape[0] * shape[1] * shape[2]
            return (jax.random.normal(k, shape, jnp.float32)
                    / jnp.sqrt(float(fan_in))).astype(jnp.float32)

        def bn_init(k, c):
            k1, k2 = jax.random.split(k)
            scale = 1.0 + 0.02 * jax.random.normal(k1, (c,), jnp.float32)
            bias = 0.02 * jax.random.normal(k2, (c,), jnp.float32)
            return scale, bias   # FrozenBN folded to affine scale/bias

        # cfg.MODEL.PIXEL_MEAN / PIXEL_STD (detectron2 defaults), view(3,1,1)
        self.pixel_mean = jnp.array([103.53, 116.28, 123.675], jnp.float32)
        self.pixel_std = jnp.array([57.375, 57.12, 58.395], jnp.float32)

        # raw parameters
        stem1_w = w_init(ks[0], (3, 3, 3, self.C_STEM))
        s1s, s1b = bn_init(ks[1], self.C_STEM)
        stem2_w = w_init(ks[2], (3, 3, self.C_STEM, self.C_RES))
        s2s, s2b = bn_init(ks[3], self.C_RES)
        bk1_w = w_init(ks[4], (1, 1, self.C_RES, self.C_BOTTLENECK))
        b1s, b1b = bn_init(ks[5], self.C_BOTTLENECK)
        bk2_w = w_init(ks[6], (3, 3, self.C_BOTTLENECK, self.C_BOTTLENECK))
        b2s, b2b = bn_init(ks[7], self.C_BOTTLENECK)
        bk3_w = w_init(ks[8], (1, 1, self.C_BOTTLENECK, self.C_RES))
        b3s, b3b = bn_init(ks[9], self.C_RES)

        # ---- stem1: fold pixel normalization + BN scale into weights/bias ----
        # conv((x-mean)/std)*scale + bias == conv_{W'}(x) + bias'   with
        #   W'  = W * scale[out] / std[in]
        #   b'  = bias - sum_{taps,in} W' * mean[in]
        # (zero padding of the normalized image == padding raw x with mean).
        w = stem1_w / self.pixel_std.reshape(1, 1, 3, 1)
        w = w * s1s.reshape(1, 1, 1, -1)
        b = s1b - jnp.sum(w * self.pixel_mean.reshape(1, 1, 3, 1), axis=(0, 1, 2))
        self.stem1_w = w.reshape(3 * 3 * 3, self.C_STEM)      # stays f32 (K=27)
        self.stem1_b = b

        # ---- remaining convs: fold BN scale into weights, cast to bf16 ----
        def fold(wk, scale, cin, cout, k):
            return (wk * scale.reshape(1, 1, 1, -1)).reshape(k * k * cin, cout
                                                             ).astype(jnp.bfloat16)

        self.stem2_w = fold(stem2_w, s2s, self.C_STEM, self.C_RES, 3)
        self.stem2_b = s2b
        self.bk1_w = fold(bk1_w, b1s, self.C_RES, self.C_BOTTLENECK, 1)
        self.bk1_b = b1b
        self.bk2_w = fold(bk2_w, b2s, self.C_BOTTLENECK, self.C_BOTTLENECK, 3)
        self.bk2_b = b2b
        self.bk3_w = fold(bk3_w, b3s, self.C_BOTTLENECK, self.C_RES, 1)
        self.bk3_b = b3b

    def backbone(self, imgs_bhwc):
        b = imgs_bhwc.shape[0]

        # stem1: stride-2 3x3 conv; pad raw pixels with the mean so the folded
        # normalization sees zero padding (matches normalize-then-zero-pad).
        patches, ho, wo = _im2col(imgs_bhwc, 3, 2, 1, pad_value=self.pixel_mean)
        x = conv_gemm(patches, self.stem1_w, self.stem1_b)
        x = x.reshape(b, ho, wo, self.C_STEM)

        # stem2 (3x3 stride 2) fused with the bottleneck 1x1 conv1; emits both
        # the shortcut activation (x2d) and the conv1 output in one kernel.
        patches, ho, wo = _im2col(x, 3, 2, 1)
        x2d, out1 = stem2_bk1(patches, self.stem2_w, self.stem2_b,
                              self.bk1_w, self.bk1_b)
        out1 = out1.reshape(b, ho, wo, self.C_BOTTLENECK)

        # bottleneck 3x3 conv2 fused with 1x1 conv3 + residual add + ReLU.
        patches, _, _ = _im2col(out1, 3, 1, 1)
        feat = bk2_bk3(patches, self.bk2_w, self.bk2_b,
                       self.bk3_w, self.bk3_b, x2d)
        return feat.reshape(b, ho, wo, self.C_RES)         # (B, H/4, W/4, C)

    def __call__(self, batched_inputs):
        # batch the images (all test inputs share one shape; ImageList padding
        # skipped, see TODO above)
        imgs = jnp.stack([s["image"].astype(jnp.float32)
                          for s in batched_inputs], axis=0)      # (B, 3, H, W)
        imgs = jnp.transpose(imgs, (0, 2, 3, 1))                 # NCHW -> NHWC
        feat = self.backbone(imgs)                               # (B, hf, wf, C)

        # concatenate ROIs across images with a batch index, pad rows to 8
        rows = []
        for bi, s in enumerate(batched_inputs):
            bx = s["gt_boxes"].astype(jnp.float32)
            rows.append(jnp.concatenate(
                [jnp.full((bx.shape[0], 1), float(bi), jnp.float32), bx], axis=1))
        boxes5 = jnp.concatenate(rows, axis=0)
        r_total = boxes5.shape[0]
        r_pad = ((r_total + 7) // 8) * 8
        if r_pad != r_total:
            pad_rows = jnp.concatenate(
                [jnp.full((r_pad - r_total, 1), -1.0, jnp.float32),
                 jnp.zeros((r_pad - r_total, 4), jnp.float32)], axis=1)
            boxes5 = jnp.concatenate([boxes5, pad_rows], axis=0)

        pooled = roi_avg_pool(feat, boxes5, 1.0 / self.STRIDE)   # (r_pad, C)
        box_features = pooled[:r_total]                          # (sum R_i, C)
        target_classes = [s["gt_classes"] for s in batched_inputs]
        return box_features, target_classes


# --------------------------------- main --------------------------------------

if __name__ == "__main__":
    key = jax.random.PRNGKey(0)
    kp, k1, k2 = jax.random.split(key, 3)
    model = ResNetROIPoolPallas(kp)

    H = W = 32
    img1 = jax.random.uniform(k1, (3, H, W), jnp.float32, 0.0, 255.0)
    img2 = jax.random.uniform(k2, (3, H, W), jnp.float32, 0.0, 255.0)
    boxes1 = jnp.array([[2.0, 3.0, 20.0, 24.0],
                        [8.0, 1.0, 30.0, 15.0],
                        [0.0, 0.0, 31.0, 31.0]], jnp.float32)
    boxes2 = jnp.array([[5.0, 5.0, 28.0, 28.0],
                        [12.0, 4.0, 22.0, 30.0]], jnp.float32)

    batched_inputs = [
        {"image": img1, "gt_boxes": boxes1,
         "gt_classes": jnp.array([1, 3, 0], jnp.int32)},
        {"image": img2, "gt_boxes": boxes2,
         "gt_classes": jnp.array([2, 5], jnp.int32)},
    ]

    box_features, target_classes = model(batched_inputs)
    jax.block_until_ready(box_features)
    for tc in target_classes:
        jax.block_until_ready(tc)

    assert box_features.shape == (5, ResNetROIPoolPallas.C_RES)
    assert box_features.dtype == jnp.float32
    assert len(target_classes) == 2
    assert bool(jnp.all(jnp.isfinite(box_features)))
    print("KERNEL_OK")
</pallas_src>

<mosaic_0001>
module attributes {stable_mosaic.version = 11 : i64} {
  func.func @_gemm_bias_relu_kernel(%arg0: i32, %arg1: memref<256x27xf32, #tpu.memory_space<vmem>>, %arg2: memref<27x128xf32, #tpu.memory_space<vmem>>, %arg3: memref<1x128xf32, #tpu.memory_space<vmem>>, %arg4: memref<256x128xbf16, #tpu.memory_space<vmem>>) attributes {dimension_semantics = [#tpu.dimension_semantics<parallel>], iteration_bounds = array<i64: 2>, scalar_prefetch = 0 : i64, scratch_operands = 0 : i64, tpu.core_type = #tpu.core_type<tc>, window_params = [{transform_indices = @transform_0, window_bounds = array<i64: 256, 27>}, {pipeline_mode = #tpu.pipeline_mode<synchronous>, transform_indices = @transform_1, window_bounds = array<i64: 27, 128>}, {pipeline_mode = #tpu.pipeline_mode<synchronous>, transform_indices = @transform_2, window_bounds = array<i64: 1, 128>}, {transform_indices = @transform_3, window_bounds = array<i64: 256, 128>}]} {
    %c0 = arith.constant 0 : index
    %c0_0 = arith.constant 0 : index
    %0 = vector.load %arg1[%c0, %c0_0] : memref<256x27xf32, #tpu.memory_space<vmem>>, vector<256x27xf32>
    %c0_1 = arith.constant 0 : index
    %c0_2 = arith.constant 0 : index
    %1 = vector.load %arg2[%c0_1, %c0_2] : memref<27x128xf32, #tpu.memory_space<vmem>>, vector<27x128xf32>
    %cst = arith.constant dense<0.000000e+00> : vector<256x128xf32>
    %2 = tpu.matmul %0, %1, %cst {dimension_numbers = #tpu.dot_dimension_numbers<[1], [0], [0], [1], [0, 0, 1, 1], [], []>} : vector<256x27xf32>, vector<27x128xf32>, vector<256x128xf32> -> vector<256x128xf32>
    %c0_3 = arith.constant 0 : index
    %c0_4 = arith.constant 0 : index
    %3 = vector.load %arg3[%c0_3, %c0_4] : memref<1x128xf32, #tpu.memory_space<vmem>>, vector<1x128xf32>
    %4 = vector.broadcast %3 : vector<1x128xf32> to vector<256x128xf32>
    %5 = arith.addf %2, %4 : vector<256x128xf32>
    %cst_5 = arith.constant 0.000000e+00 : f32
    %6 = vector.broadcast %cst_5 : f32 to vector<256x128xf32>
    %7 = arith.maximumf %5, %6 : vector<256x128xf32>
    %8 = arith.truncf %7 : vector<256x128xf32> to vector<256x128xbf16>
    %c0_6 = arith.constant 0 : index
    %c0_7 = arith.constant 0 : index
    %9 = vector.load %arg4[%c0_6, %c0_7] : memref<256x128xbf16, #tpu.memory_space<vmem>>, vector<256x128xbf16>
    tpu.vector_store %arg4[%c0_6, %c0_7], %8 {strides = array<i32>} : memref<256x128xbf16, #tpu.memory_space<vmem>>, vector<256x128xbf16>,
    return
  }
  func.func @transform_0(%arg0: i32) -> (i32, i32) {
    %c0_i32 = arith.constant 0 : i32
    %c0_i32_0 = arith.constant 0 : i32
    return %arg0, %c0_i32 : i32, i32
  }
  func.func @transform_1(%arg0: i32) -> (i32, i32) {
    %c0_i32 = arith.constant 0 : i32
    %c0_i32_0 = arith.constant 0 : i32
    %c0_i32_1 = arith.constant 0 : i32
    return %c0_i32, %c0_i32_0 : i32, i32
  }
  func.func @transform_2(%arg0: i32) -> (i32, i32) {
    %c0_i32 = arith.constant 0 : i32
    %c0_i32_0 = arith.constant 0 : i32
    %c0_i32_1 = arith.constant 0 : i32
    return %c0_i32, %c0_i32_0 : i32, i32
  }
  func.func @transform_3(%arg0: i32) -> (i32, i32) {
    %c0_i32 = arith.constant 0 : i32
    %c0_i32_0 = arith.constant 0 : i32
    return %arg0, %c0_i32 : i32, i32
  }
}

</mosaic_0001>

<bundles_post_ra>
// kernel: tpu_custom_call.1
= control target key start
LH: loop header
LB: loop body
LE: loop exit
PB: predicated region body
PF: predicated region fallthrough
CT: control target
= control target key end

     0   :  { %8 = vsyncpa [#allocation3], 0  ;;  %s1103_s0 = inlined_call_operand.vmem [shape: f32[512,27], index: 0, kind: input, shape index: {}]   ;;  %s1104_s1 = inlined_call_operand.vmem [shape: f32[27,128], index: 1, kind: input, shape index: {}]   ;;  %s1105_s2 = inlined_call_operand.vmem [shape: f32[1,128], index: 2, kind: input, shape index: {}]   ;;  %s1106_s3 = inlined_call_operand.hbm [shape: bf16[512,128], index: 3, kind: output, shape index: {}]  }
   0x1   :  { %10 = vsyncpa [#allocation3 + $0x1], 0  ;;  %s881_s12 = smov 0   ;;  %s883_s13 = smov 0  }
   0x2   :  { %s885_s14 = smov 0   ;;  %s887_s15 = smov 0  }
   0x3 LB: > { %s902_s16 = sadd.s32 4294967295, %s857_s15   ;;  %s600_s17 = sadd.s32 4294967294, %s857_s15   ;;  %s857_s15 = sphi %s887_s15, %s1112_s15   ;;  %s853_s14 = sphi %s885_s14, %s1111_s14   ;;  %s849_s13 = sphi %s883_s13, %s1110_s13   ;;  %s845_s12 = sphi %s881_s12, %s1109_s12  }
   0x4   : > { %s906_s18 = sadd.s32 1, %s857_s15   ;;  %s91_s19 = sadd.s32 1, %s853_s14 }
   0x5   : > { %s88_s20 = ssub.s32 %s857_s15, %s906_s18  ;;  %p101_p0 = scmp.ne.s32.totalorder %s853_s14, %s849_s13 }
   0x6   : > { %p89_p1 = scmp.eq.s32.totalorder %s88_s20, 0  ;;  %p102_p2 = scmp.eq.s32.totalorder %s902_s16, 1 }
   0x7   : > { %p107_p3 = scmp.ne.s32.totalorder %s849_s13, %s845_s12  ;;  %p108_p4 = scmp.eq.s32.totalorder %s600_s17, 1 }
   0x8   : > { %s917_s21 = scalar_select %p89_p1, %s853_s14, %s91_s19  }
   0x9   : > { %p919_p5 = por %p102_p2, %p101_p0  ;;  %p923_p6 = por %p108_p4, %p107_p3 }
   0xa   : > { %p603_p7 = scmp.ge.s32.totalorder %s857_s15, 1  ;;  %p141_p8 = scmp.lt.s32.totalorder %s857_s15, 3 }
   0xc   : > { %p142_p9 = pnand %p603_p7, %p141_p8 }
   0xd   : > { %s605_s28 = sshll.u32 (!%p142_p9), %s902_s16, 5  ;;  %s162_s17 = sand.u32 (!%p142_p9), 1, %s849_s13  }
   0xe   : > { %145 = sbr.rel (%p142_p9) target bundleno = 228 (0xe4), region = 32  ;;  %p166_p10 = scmp.lt.s32.totalorder (!%p142_p9), %s605_s28, 63 }
   0xf   : > { %s604_s19 = sshll.u32 (!%p142_p9), %s162_s17, 7  ;;  %s645_s24 = sshll.u32 (!%p142_p9), %s902_s16, 7 }
  0x10   : > { %s1025_s20 = scalar_lea.vmem (!%p142_p9), [#allocation2], %s604_s19  ;;  %s534_s27 = scalar_lea.hbm (!%p142_p9), %s1106_s3, %s645_s24 }
  0x11   : > { %s535_s16 = sshll.u32 (!%p142_p9), %s1025_s20, 4  ;;  %s523_s29 = scalar_lea.sflag (!%p142_p9), [#allocation3], %s162_s17  ;;  %s536_s16 = int_to_ptr.vmem [resolvable:$true] %s535_s16 }
  0x12   : > { %s815_s7 = scalar_lea.hbm (!%p142_p9), %s1106_s3, 256 }
  0x13   : > { %v207_v0 = vld [vmem:[%s1104_s1 + $0x18] sm:$0x7]  ;;  %vm309_vm0 = vcmask 1042432   ;;  %v206_v1 = vld [vmem:[%s1104_s1 + $0x10] sm:$0xff]  ;;  %v205_v2 = vld [vmem:[%s1104_s1 + $0x8] sm:$0xff]  ;;  %s1114_s28 = smov (!%p166_p10, %s605_s28), 63 }
  0x14   : > { %607 = vmatpush.msk.msra.mxu0 %vm309_vm0, %v207_v0  ;;  %741 = vmatpush.msk.msra.mxu1 %vm309_vm0, %v207_v0  ;;  %v204_v3 = vld [vmem:[%s1104_s1] sm:$0xff]  ;;  %s606_s6 = sshll.u32 %s1114_s28, 3  ;;  %vm212_vm1 = vcmask 220160   ;;  %s537_s28 = sshll.u32 %s534_s27, 4  ;;  %s538_s28 = int_to_ptr.hbm [resolvable:$true] %s537_s28 }
  0x15   : > { %742 = vmatpush.msk.msra.mxu2 %vm309_vm0, %v207_v0  ;;  %743 = vmatpush.msk.msra.mxu3 %vm309_vm0, %v207_v0  ;;  %s945_s9 = scalar_lea.vmem %s1103_s0, %s606_s6  ;;  %v1014_v38 = vld [vmem:[%s1105_s2] ss:$0 sm:$0xff]  ;;  %s809_s30 = sshra.s32 %s538_s28, 4  ;;  %s810_s30 = int_to_ptr.hbm [resolvable:$true] %s809_s30 }
  0x16   : > { %326 = vmatpush.msra.mxu0 %v206_v1  ;;  %744 = vmatpush.msra.mxu1 %v206_v1  ;;  %v172_v4 = vld [vmem:[%s945_s9] sm:$0xff]  ;;  %v173_v8 = vld [vmem:[%s945_s9 + $0x8] sm:$0xff]  ;;  %v174_v12 = vld [vmem:[%s945_s9 + $0x10] sm:$0xff]  ;;  %s811_s4 = scalar_lea.hbm %s810_s30, 128  ;;  %p816_p0 = scmp.lt.s32.totalorder %s810_s30, %s1106_s3 }
  0x17   : > { %745 = vmatpush.msra.mxu2 %v206_v1  ;;  %746 = vmatpush.msra.mxu3 %v206_v1  ;;  %v180_v5 = vld [vmem:[%s945_s9 + $0x40] sm:$0xff]  ;;  %v181_v9 = vld [vmem:[%s945_s9 + $0x48] sm:$0xff]  ;;  %v182_v13 = vld [vmem:[%s945_s9 + $0x50] sm:$0xff]  ;;  %p812_p11 = scmp.ne.s32.totalorder %s810_s30, %s811_s4  ;;  %p817_p1 = scmp.lt.s32.totalorder %s815_s7, %s811_s4 }
  0x18   : > { %327 = vmatpush.msra.mxu0 %v205_v2  ;;  %747 = vmatpush.msra.mxu1 %v205_v2  ;;  %v188_v6 = vld [vmem:[%s945_s9 + $0x80] sm:$0xff]  ;;  %v189_v10 = vld [vmem:[%s945_s9 + $0x88] sm:$0xff]  ;;  %v190_v14 = vld [vmem:[%s945_s9 + $0x90] sm:$0xff] }
  0x19   : > { %748 = vmatpush.msra.mxu2 %v205_v2  ;;  %749 = vmatpush.msra.mxu3 %v205_v2  ;;  %v196_v7 = vld [vmem:[%s945_s9 + $0xc0] sm:$0xff]  ;;  %v197_v11 = vld [vmem:[%s945_s9 + $0xc8] sm:$0xff]  ;;  %v198_v15 = vld [vmem:[%s945_s9 + $0xd0] sm:$0xff]  ;;  %p813_p12 = pnand %p812_p11, %p919_p5  ;;  %p818_p2 = por %p817_p1, %p816_p0 }
  0x1a   : > { %328 = vmatpush.msra.mxu0 %v204_v3  ;;  %750 = vmatpush.msra.mxu1 %v204_v3  ;;  %v175_v16 = vld [vmem:[%s945_s9 + $0x18] sm:$0xff]  ;;  %v176_v20 = vld [vmem:[%s945_s9 + $0x20] sm:$0xff]  ;;  %v177_v24 = vld [vmem:[%s945_s9 + $0x28] sm:$0xff] }
  0x1b   : > { %751 = vmatpush.msra.mxu2 %v204_v3  ;;  %752 = vmatpush.msra.mxu3 %v204_v3  ;;  %v183_v17 = vld [vmem:[%s945_s9 + $0x58] sm:$0xff]  ;;  %v184_v21 = vld [vmem:[%s945_s9 + $0x60] sm:$0xff]  ;;  %v185_v25 = vld [vmem:[%s945_s9 + $0x68] sm:$0xff]  ;;  %p814_p13 = pneg %p813_p12 }
  0x1c   : > { %608 = vmatmul.msk.f32.vlgmr.msra.gmra.mxu0 %vm212_vm1, %v172_v4  ;;  %616 = vmatmul.msk.f32.vlgmr.msra.gmra.mxu1 %vm212_vm1, %v180_v5  ;;  %v191_v18 = vld [vmem:[%s945_s9 + $0x98] sm:$0xff]  ;;  %v192_v22 = vld [vmem:[%s945_s9 + $0xa0] sm:$0xff]  ;;  %v193_v26 = vld [vmem:[%s945_s9 + $0xa8] sm:$0xff] }
  0x1d   : > { %624 = vmatmul.msk.f32.vlgmr.msra.gmra.mxu2 %vm212_vm1, %v188_v6  ;;  %632 = vmatmul.msk.f32.vlgmr.msra.gmra.mxu3 %vm212_vm1, %v196_v7  ;;  %v199_v19 = vld [vmem:[%s945_s9 + $0xd8] sm:$0xff]  ;;  %v200_v23 = vld [vmem:[%s945_s9 + $0xe0] sm:$0xff]  ;;  %v201_v27 = vld [vmem:[%s945_s9 + $0xe8] sm:$0xff]  ;;  %p819_p3 = pnand %p818_p2, %p814_p13 }
  0x1e   : > { %v178_v28 = vld [vmem:[%s945_s9 + $0x30] sm:$0xff]  ;;  %v179_v32 = vld [vmem:[%s945_s9 + $0x38] sm:$0xff] }
  0x1f   : > { %v186_v29 = vld [vmem:[%s945_s9 + $0x70] sm:$0xff]  ;;  %v187_v33 = vld [vmem:[%s945_s9 + $0x78] sm:$0xff] }
  0x20   : > { %v194_v30 = vld [vmem:[%s945_s9 + $0xb0] sm:$0xff]  ;;  %v195_v34 = vld [vmem:[%s945_s9 + $0xb8] sm:$0xff] }
  0x21   : > { %v202_v31 = vld [vmem:[%s945_s9 + $0xf0] sm:$0xff]  ;;  %v203_v35 = vld [vmem:[%s945_s9 + $0xf8] sm:$0xff] }
  0x24   : > { %609 = vmatmul.msk.f32.gmra.mxu0 %vm212_vm1, %v173_v8  ;;  %617 = vmatmul.msk.f32.gmra.mxu1 %vm212_vm1, %v181_v9 }
  0x25   : > { %625 = vmatmul.msk.f32.gmra.mxu2 %vm212_vm1, %v189_v10  ;;  %633 = vmatmul.msk.f32.gmra.mxu3 %vm212_vm1, %v197_v11 }
  0x2c   : > { %610 = vmatmul.msk.f32.gmra.mxu0 %vm212_vm1, %v174_v12  ;;  %618 = vmatmul.msk.f32.gmra.mxu1 %vm212_vm1, %v182_v13 }
  0x2d   : > { %626 = vmatmul.msk.f32.gmra.mxu2 %vm212_vm1, %v190_v14  ;;  %634 = vmatmul.msk.f32.gmra.mxu3 %vm212_vm1, %v198_v15 }
  0x34   : > { %611 = vmatmul.msk.f32.gmra.mxu0 %vm212_vm1, %v175_v16  ;;  %619 = vmatmul.msk.f32.gmra.mxu1 %vm212_vm1, %v183_v17 }
  0x35   : > { %627 = vmatmul.msk.f32.gmra.mxu2 %vm212_vm1, %v191_v18  ;;  %635 = vmatmul.msk.f32.gmra.mxu3 %vm212_vm1, %v199_v19 }
  0x3c   : > { %612 = vmatmul.msk.f32.gmra.mxu0 %vm212_vm1, %v176_v20  ;;  %620 = vmatmul.msk.f32.gmra.mxu1 %vm212_vm1, %v184_v21 }
  0x3d   : > { %628 = vmatmul.msk.f32.gmra.mxu2 %vm212_vm1, %v192_v22  ;;  %636 = vmatmul.msk.f32.gmra.mxu3 %vm212_vm1, %v200_v23 }
  0x44   : > { %613 = vmatmul.msk.f32.gmra.mxu0 %vm212_vm1, %v177_v24  ;;  %621 = vmatmul.msk.f32.gmra.mxu1 %vm212_vm1, %v185_v25 }
  0x45   : > { %629 = vmatmul.msk.f32.gmra.mxu2 %vm212_vm1, %v193_v26  ;;  %637 = vmatmul.msk.f32.gmra.mxu3 %vm212_vm1, %v201_v27 }
  0x4c   : > { %614 = vmatmul.msk.f32.gmra.mxu0 %vm212_vm1, %v178_v28  ;;  %622 = vmatmul.msk.f32.gmra.mxu1 %vm212_vm1, %v186_v29 }
  0x4d   : > { %630 = vmatmul.msk.f32.gmra.mxu2 %vm212_vm1, %v194_v30  ;;  %638 = vmatmul.msk.f32.gmra.mxu3 %vm212_vm1, %v202_v31 }
  0x54   : > { %615 = vmatmul.msk.f32.gmra.mxu0 %vm212_vm1, %v179_v32  ;;  %623 = vmatmul.msk.f32.gmra.mxu1 %vm212_vm1, %v187_v33 }
  0x55   : > { %631 = vmatmul.msk.f32.gmra.mxu2 %vm212_vm1, %v195_v34  ;;  %639 = vmatmul.msk.f32.gmra.mxu3 %vm212_vm1, %v203_v35 }
  0x99   : > { %v330_v36 = vpop.f32.mrf.mxu0  ;;  %v354_v37 = vpop.f32.mrf.mxu1 }
  0x9a   : > { %v331_v39 = vadd.f32 %v1014_v38, %v330_v36  ;;  %v355_v40 = vadd.f32 %v1014_v38, %v354_v37 }
  0x9c   : > { %v426_v47 = vmax.f32 %v331_v39, 0.0  ;;  %v434_v48 = vmax.f32 %v355_v40, 0.0 }
  0xa0   : > { %v378_v41 = vpop.f32.mrf.mxu2  ;;  %v402_v42 = vpop.f32.mrf.mxu3 }
  0xa1   : > { %v333_v43 = vpop.f32.mrf.mxu0  ;;  %v357_v44 = vpop.f32.mrf.mxu1  ;;  %v379_v53 = vadd.f32 %v1014_v38, %v378_v41  ;;  %v403_v54 = vadd.f32 %v1014_v38, %v402_v42 }
  0xa2   : > { %v334_v45 = vadd.f32 %v1014_v38, %v333_v43  ;;  %v358_v46 = vadd.f32 %v1014_v38, %v357_v44 }
  0xa3   : > { %v442_v61 = vmax.f32 %v379_v53, 0.0  ;;  %v450_v62 = vmax.f32 %v403_v54, 0.0 }
  0xa4   : > { %v427_v49 = vmax.f32 %v334_v45, 0.0  ;;  %v435_v50 = vmax.f32 %v358_v46, 0.0 }
  0xa6   : > { %v649_v51 = vpack.c.bf16 %v427_v49, %v426_v47  ;;  %v669_v52 = vpack.c.bf16 %v435_v50, %v434_v48 }
  0xa8   : > { %650 = vst [vmem:[%s1025_s20] sm:$0xff] %v649_v51   ;;  %v381_v55 = vpop.f32.mrf.mxu2  ;;  %v405_v56 = vpop.f32.mrf.mxu3 }
  0xa9   : > { %729 = vst [vmem:[%s1025_s20 + $0x20] sm:$0xff] %v669_v52   ;;  %v382_v57 = vadd.f32 %v1014_v38, %v381_v55  ;;  %v406_v58 = vadd.f32 %v1014_v38, %v405_v56  ;;  %v336_v59 = vpop.f32.mrf.mxu0  ;;  %v360_v60 = vpop.f32.mrf.mxu1 }
  0xaa   : > { %v337_v3 = vadd.f32 %v1014_v38, %v336_v59  ;;  %v361_v4 = vadd.f32 %v1014_v38, %v360_v60 }
  0xab   : > { %v443_v63 = vmax.f32 %v382_v57, 0.0  ;;  %v451_v0 = vmax.f32 %v406_v58, 0.0 }
  0xac   : > { %v428_v11 = vmax.f32 %v337_v3, 0.0  ;;  %v436_v12 = vmax.f32 %v361_v4, 0.0 }
  0xad   : > { %v689_v1 = vpack.c.bf16 %v443_v63, %v442_v61  ;;  %v709_v2 = vpack.c.bf16 %v451_v0, %v450_v62 }
  0xaf   : > { %733 = vst [vmem:[%s1025_s20 + $0x40] sm:$0xff] %v689_v1  }
  0xb0   : > { %737 = vst [vmem:[%s1025_s20 + $0x60] sm:$0xff] %v709_v2   ;;  %v384_v5 = vpop.f32.mrf.mxu2  ;;  %v408_v6 = vpop.f32.mrf.mxu3 }
  0xb1   : > { %v339_v7 = vpop.f32.mrf.mxu0  ;;  %v363_v8 = vpop.f32.mrf.mxu1  ;;  %v385_v17 = vadd.f32 %v1014_v38, %v384_v5  ;;  %v409_v18 = vadd.f32 %v1014_v38, %v408_v6 }
  0xb2   : > { %v340_v9 = vadd.f32 %v1014_v38, %v339_v7  ;;  %v364_v10 = vadd.f32 %v1014_v38, %v363_v8 }
  0xb3   : > { %v444_v25 = vmax.f32 %v385_v17, 0.0  ;;  %v452_v26 = vmax.f32 %v409_v18, 0.0 }
  0xb4   : > { %v429_v13 = vmax.f32 %v340_v9, 0.0  ;;  %v437_v14 = vmax.f32 %v364_v10, 0.0 }
  0xb6   : > { %v654_v15 = vpack.c.bf16 %v429_v13, %v428_v11  ;;  %v674_v16 = vpack.c.bf16 %v437_v14, %v436_v12 }
  0xb8   : > { %726 = vst [vmem:[%s1025_s20 + $0x8] sm:$0xff] %v654_v15   ;;  %v387_v19 = vpop.f32.mrf.mxu2  ;;  %v411_v20 = vpop.f32.mrf.mxu3 }
  0xb9   : > { %730 = vst [vmem:[%s1025_s20 + $0x28] sm:$0xff] %v674_v16   ;;  %v388_v21 = vadd.f32 %v1014_v38, %v387_v19  ;;  %v412_v22 = vadd.f32 %v1014_v38, %v411_v20  ;;  %v342_v23 = vpop.f32.mrf.mxu0  ;;  %v366_v24 = vpop.f32.mrf.mxu1 }
  0xba   : > { %v343_v31 = vadd.f32 %v1014_v38, %v342_v23  ;;  %v367_v32 = vadd.f32 %v1014_v38, %v366_v24 }
  0xbb   : > { %v445_v27 = vmax.f32 %v388_v21, 0.0  ;;  %v453_v28 = vmax.f32 %v412_v22, 0.0 }
  0xbc   : > { %v430_v40 = vmax.f32 %v343_v31, 0.0  ;;  %v438_v41 = vmax.f32 %v367_v32, 0.0 }
  0xbd   : > { %v694_v29 = vpack.c.bf16 %v445_v27, %v444_v25  ;;  %v714_v30 = vpack.c.bf16 %v453_v28, %v452_v26 }
  0xbf   : > { %734 = vst [vmem:[%s1025_s20 + $0x48] sm:$0xff] %v694_v29  }
  0xc0   : > { %738 = vst [vmem:[%s1025_s20 + $0x68] sm:$0xff] %v714_v30   ;;  %v390_v33 = vpop.f32.mrf.mxu2  ;;  %v414_v34 = vpop.f32.mrf.mxu3 }
  0xc1   : > { %v345_v35 = vpop.f32.mrf.mxu0  ;;  %v369_v36 = vpop.f32.mrf.mxu1  ;;  %v391_v46 = vadd.f32 %v1014_v38, %v390_v33  ;;  %v415_v47 = vadd.f32 %v1014_v38, %v414_v34 }
  0xc2   : > { %v346_v37 = vadd.f32 %v1014_v38, %v345_v35  ;;  %v370_v39 = vadd.f32 %v1014_v38, %v369_v36 }
  0xc3   : > { %v446_v54 = vmax.f32 %v391_v46, 0.0  ;;  %v454_v55 = vmax.f32 %v415_v47, 0.0 }
  0xc4   : > { %v431_v42 = vmax.f32 %v346_v37, 0.0  ;;  %v439_v43 = vmax.f32 %v370_v39, 0.0 }
  0xc6   : > { %v659_v44 = vpack.c.bf16 %v431_v42, %v430_v40  ;;  %v679_v45 = vpack.c.bf16 %v439_v43, %v438_v41 }
  0xc8   : > { %727 = vst [vmem:[%s1025_s20 + $0x10] sm:$0xff] %v659_v44   ;;  %v393_v48 = vpop.f32.mrf.mxu2  ;;  %v417_v49 = vpop.f32.mrf.mxu3 }
  0xc9   : > { %731 = vst [vmem:[%s1025_s20 + $0x30] sm:$0xff] %v679_v45   ;;  %v394_v50 = vadd.f32 %v1014_v38, %v393_v48  ;;  %v418_v51 = vadd.f32 %v1014_v38, %v417_v49  ;;  %v348_v52 = vpop.f32.mrf.mxu0  ;;  %v372_v53 = vpop.f32.mrf.mxu1 }
  0xca   : > { %v349_v60 = vadd.f32 %v1014_v38, %v348_v52  ;;  %v373_v61 = vadd.f32 %v1014_v38, %v372_v53 }
  0xcb   : > { %v447_v56 = vmax.f32 %v394_v50, 0.0  ;;  %v455_v57 = vmax.f32 %v418_v51, 0.0 }
  0xcc   : > { %v432_v4 = vmax.f32 %v349_v60, 0.0  ;;  %v440_v5 = vmax.f32 %v373_v61, 0.0 }
  0xcd   : > { %v699_v58 = vpack.c.bf16 %v447_v56, %v446_v54  ;;  %v719_v59 = vpack.c.bf16 %v455_v57, %v454_v55 }
  0xcf   : > { %735 = vst [vmem:[%s1025_s20 + $0x50] sm:$0xff] %v699_v58  }
  0xd0   : > { %739 = vst [vmem:[%s1025_s20 + $0x70] sm:$0xff] %v719_v59   ;;  %v396_v62 = vpop.f32.mrf.mxu2  ;;  %v420_v63 = vpop.f32.mrf.mxu3 }
  0xd1   : > { %v351_v0 = vpop.f32.mrf.mxu0  ;;  %v375_v1 = vpop.f32.mrf.mxu1  ;;  %v397_v10 = vadd.f32 %v1014_v38, %v396_v62  ;;  %v421_v11 = vadd.f32 %v1014_v38, %v420_v63 }
  0xd2   : > { %v352_v2 = vadd.f32 %v1014_v38, %v351_v0  ;;  %v376_v3 = vadd.f32 %v1014_v38, %v375_v1 }
  0xd3   : > { %v448_v16 = vmax.f32 %v397_v10, 0.0  ;;  %v456_v17 = vmax.f32 %v421_v11, 0.0 }
  0xd4   : > { %v433_v6 = vmax.f32 %v352_v2, 0.0  ;;  %v441_v7 = vmax.f32 %v376_v3, 0.0 }
  0xd6   : > { %v664_v8 = vpack.c.bf16 %v433_v6, %v432_v4  ;;  %v684_v9 = vpack.c.bf16 %v441_v7, %v440_v5 }
  0xd8   : > { %728 = vst [vmem:[%s1025_s20 + $0x18] sm:$0xff] %v664_v8   ;;  %v399_v12 = vpop.f32.mrf.mxu2  ;;  %v423_v13 = vpop.f32.mrf.mxu3 }
  0xd9   : > { %732 = vst [vmem:[%s1025_s20 + $0x38] sm:$0xff] %v684_v9   ;;  %v400_v14 = vadd.f32 %v1014_v38, %v399_v12  ;;  %v424_v15 = vadd.f32 %v1014_v38, %v423_v13 }
  0xdb   : > { %v449_v18 = vmax.f32 %v400_v14, 0.0  ;;  %v457_v19 = vmax.f32 %v424_v15, 0.0 }
  0xdd   : > { %v704_v20 = vpack.c.bf16 %v449_v18, %v448_v16  ;;  %v724_v21 = vpack.c.bf16 %v457_v19, %v456_v17 }
  0xdf   : > { %736 = vst [vmem:[%s1025_s20 + $0x58] sm:$0xff] %v704_v20  }
  0xe0   : > { %740 = vst [vmem:[%s1025_s20 + $0x78] sm:$0xff] %v724_v21  }
  0xe1   : > { %822 = shalt.err (!%p819_p3)
}
  0xe2   : > { %s859_s10 = smov 64   ;;  %s860_s11 = smov 4  }
  0xe3   : > { %753 = dma.vmem_to_hbm [thread:$0]  (%p919_p5), %s536_s16, 2048, %s538_s28, %s523_s29, %s859_s10, %s859_s10, %s860_s11  }
  0xe4 PF: > { %p759_p4 = scmp.ge.s32.totalorder %s857_s15, 2  ;;  %s552_s17 = sand.u32 1, %s845_s12  }
  0xe5   : > { %s553_s19 = scalar_lea.sflag [#allocation3], %s552_s17 }
  0xe6   : > { %p756_p7 = pnand %p759_p4, %p923_p6 }
  0xe8   : > { %p757_p8 = pneg %p756_p7 }
  0xea   : > { %840 = dma.done.wait (%p757_p8), %s553_s19, 2048  }
  0xeb   : > { %842 = vsyncadd (%p757_p8), %s553_s19, 4294965248  ;;  %p13_p9 = scmp.ge.s32.totalorder %s906_s18, 4   ;;  %s1109_s12 = smov %s849_s13 }
  0xec   : > { %s1110_s13 = smov %s853_s14  ;;  %s1111_s14 = smov %s917_s21 }
  0xed   : > { %s1112_s15 = smov %s906_s18  ;;  %15 = sbr.rel (!%p13_p9) target bundleno = 3 (0x3), region = 67 }
  0xf2   :  { %559 = vsyncpa [#allocation3], 1 }
  0xf3   :  { %561 = vsyncpa [#allocation3 + $0x1], 1 }

</bundles_post_ra>
